<compile_context>
chip_gen: v6e
topology: v6e:2x2x1
jax: 0.10.0
libtpu: 0.0.40
codegen_flags: <defaults>
</compile_context>

<pallas_src>
import functools

import jax
import jax.numpy as jnp
from jax import lax
from jax.experimental import pallas as pl
from jax.experimental.pallas import tpu as pltpu


_NUM_CORE_SPLITS = 2   # leading "parallel" grid axis: 2 TCs on v7x, serial elsewhere


# ----------------------------------------------------------------------------
# Pallas kernel: fused masked partial-sum reduction for the YOLOv3 loss terms
# ----------------------------------------------------------------------------
def _yolo_loss_kernel(obj_cnt_ref, pred_ref, tgt_ref, out_ref):
    # obj_cnt_ref : SMEM (num_tiles,) int32 — obj cells per tile (scalar prefetch)
    # pred_ref    : VMEM (5+C, tile_s, 128) bf16 logits; channels 2/3 already
    #               carry log(anchor_w)/log(anchor_h) folded in.
    # tgt_ref     : VMEM (6+C, tile_s, 128) f32 rows =
    #               [tx, ty, tw, th, tconf(==obj_mask), tcls_0..C-1, noobj_mask]
    # out_ref     : VMEM (1, 4, 8, 128) f32 per-core partial accumulator rows =
    #               [coord_sq(obj), bce_conf(obj), bce_conf(noobj), bce_cls(obj)]
    c = pl.program_id(0)
    i = pl.program_id(1)
    tile_idx = c * pl.num_programs(1) + i
    num_classes = pred_ref.shape[0] - 5
    tile_s = pred_ref.shape[1]

    @pl.when(i == 0)
    def _init():
        out_ref[...] = jnp.zeros_like(out_ref)

    def bce_logits(z, t):
        # BCE(sigmoid(z), t) from logits: max(z,0) - z*t + log(1 + exp(-|z|))
        return jnp.maximum(z, 0.0) - z * t + jnp.log(1.0 + jnp.exp(-jnp.abs(z)))

    def row_reduce(v):
        # (tile_s, 128) -> (8, 128) partial sum: pure vreg adds, no XLU.
        return jnp.sum(v.reshape(tile_s // 8, 8, 128), axis=0)

    # ---- unconditional confidence path (one BCE per cell) -------------------
    conf_logit = pred_ref[4].astype(jnp.float32)
    tconf = tgt_ref[4].astype(jnp.float32)
    noobj = tgt_ref[5 + num_classes].astype(jnp.float32)
    bce_conf = bce_logits(conf_logit, tconf)
    out_ref[0, 2] += row_reduce(noobj * bce_conf)

    # ---- obj-masked path: skipped entirely when the tile has no GT cells ----
    @pl.when(obj_cnt_ref[tile_idx] > 0)
    def _obj_terms():
        obj = tconf   # obj_mask == tconf in the reference
        # sigmoid(z) = 0.5*tanh(0.5*z) + 0.5 : one EUP op instead of exp+recip
        x = 0.5 * jnp.tanh(0.5 * pred_ref[0].astype(jnp.float32)) + 0.5
        y = 0.5 * jnp.tanh(0.5 * pred_ref[1].astype(jnp.float32)) + 0.5
        ew = jnp.exp(pred_ref[2].astype(jnp.float32))   # == exp(w) * anchor_w
        eh = jnp.exp(pred_ref[3].astype(jnp.float32))   # == exp(h) * anchor_h
        coord_sq = ((x - tgt_ref[0].astype(jnp.float32)) ** 2
                    + (y - tgt_ref[1].astype(jnp.float32)) ** 2
                    + (ew - tgt_ref[2].astype(jnp.float32)) ** 2
                    + (eh - tgt_ref[3].astype(jnp.float32)) ** 2)
        # where (not multiply) so an overflowed exp() on a non-obj cell can
        # never poison the sum with inf * 0.
        out_ref[0, 0] += row_reduce(jnp.where(obj > 0.0, coord_sq, 0.0))
        out_ref[0, 1] += row_reduce(obj * bce_conf)

        def cls_body(k, acc):
            z = pred_ref[5 + k].astype(jnp.float32)
            t = tgt_ref[5 + k].astype(jnp.float32)
            return acc + bce_logits(z, t)

        bce_cls = lax.fori_loop(0, num_classes, cls_body,
                                jnp.zeros((tile_s, 128), jnp.float32),
                                unroll=min(8, num_classes))
        out_ref[0, 3] += row_reduce(obj * bce_cls)


def _run_loss_kernel(obj_cnt, pred_tiles, tgt_tiles, tile_s, tiles_per_core):
    d_pred = pred_tiles.shape[0]
    d_tgt = tgt_tiles.shape[0]
    return pl.pallas_call(
        _yolo_loss_kernel,
        out_shape=jax.ShapeDtypeStruct((_NUM_CORE_SPLITS, 4, 8, 128), jnp.float32),
        grid_spec=pltpu.PrefetchScalarGridSpec(
            num_scalar_prefetch=1,
            grid=(_NUM_CORE_SPLITS, tiles_per_core),
            in_specs=[
                pl.BlockSpec((d_pred, tile_s, 128),
                             lambda c, i, cnt: (0, c * tiles_per_core + i, 0)),
                pl.BlockSpec((d_tgt, tile_s, 128),
                             lambda c, i, cnt: (0, c * tiles_per_core + i, 0)),
            ],
            out_specs=pl.BlockSpec((1, 4, 8, 128),
                                   lambda c, i, cnt: (c, 0, 0, 0)),
        ),
        compiler_params=pltpu.CompilerParams(
            dimension_semantics=("parallel", "arbitrary"),
            vmem_limit_bytes=32 * 1024 * 1024,
        ),
    )(obj_cnt, pred_tiles, tgt_tiles)


# ----------------------------------------------------------------------------
# build_targets (plain JAX glue).
# TODO(synk): the data-dependent scatter of GT boxes onto the grid has no clean
# Pallas equivalent on TPU; kept in JAX.  tcls is built channel-major to avoid
# a (N, C) -> (C, N) relayout before the kernel.
# ----------------------------------------------------------------------------
def build_targets(targets, scaled_anchors, batch_size, num_anchors, grid_size,
                  num_classes, ignore_thresh):
    # targets: (T, 6) = [batch_idx, class, x, y, w, h], coords normalized [0,1]
    anchors = jnp.asarray(scaled_anchors, dtype=jnp.float32)  # (A, 2)

    gx = targets[:, 2] * grid_size
    gy = targets[:, 3] * grid_size
    gw = targets[:, 4] * grid_size
    gh = targets[:, 5] * grid_size

    gi = jnp.clip(jnp.floor(gx).astype(jnp.int32), 0, grid_size - 1)
    gj = jnp.clip(jnp.floor(gy).astype(jnp.int32), 0, grid_size - 1)
    b = targets[:, 0].astype(jnp.int32)
    cls_idx = targets[:, 1].astype(jnp.int32)

    # anchor / GT width-height IoU
    inter = (jnp.minimum(gw[:, None], anchors[None, :, 0])
             * jnp.minimum(gh[:, None], anchors[None, :, 1]))
    union = (gw[:, None] * gh[:, None]
             + anchors[None, :, 0] * anchors[None, :, 1] - inter)
    ious = inter / union                      # (T, A)
    best = jnp.argmax(ious, axis=1)           # (T,)

    shp = (batch_size, num_anchors, grid_size, grid_size)
    obj_mask = jnp.zeros(shp, jnp.float32).at[b, best, gj, gi].set(1.0)
    noobj_mask = jnp.ones(shp, jnp.float32).at[b, best, gj, gi].min(0.0)
    # ignore anchors whose IoU with any GT exceeds the threshold
    for a in range(num_anchors):
        ignore = jnp.where(ious[:, a] > ignore_thresh, 0.0, 1.0)
        noobj_mask = noobj_mask.at[b, a, gj, gi].min(ignore)

    tx = jnp.zeros(shp, jnp.float32).at[b, best, gj, gi].set(gx - gi)
    ty = jnp.zeros(shp, jnp.float32).at[b, best, gj, gi].set(gy - gj)
    tw = jnp.zeros(shp, jnp.float32).at[b, best, gj, gi].set(gw)
    th = jnp.zeros(shp, jnp.float32).at[b, best, gj, gi].set(gh)
    tcls = jnp.zeros((num_classes,) + shp, jnp.float32)          # channel-major
    tcls = tcls.at[cls_idx, b, best, gj, gi].set(1.0)
    tconf = obj_mask
    return obj_mask, noobj_mask, tx, ty, tw, th, tcls, tconf


# ----------------------------------------------------------------------------
# Module wrapper
# ----------------------------------------------------------------------------
def yolov3_loss(pred, targets, *, anchors, image_size, num_classes,
                ignore_thresh=0.5, pred_dtype=jnp.bfloat16):
    # pred: (B, A, G, G, 5 + num_classes) raw logits (channels-last head)
    batch_size, num_anchors, grid_size = pred.shape[0], pred.shape[1], pred.shape[2]
    depth = 5 + num_classes
    stride = image_size / grid_size
    scaled_anchors = [(a_w / stride, a_h / stride) for a_w, a_h in anchors]

    (obj_mask, noobj_mask, tx, ty, tw, th, tcls_cm, tconf) = build_targets(
        targets, scaled_anchors, batch_size, num_anchors, grid_size,
        num_classes, ignore_thresh)

    n_flat = batch_size * num_anchors * grid_size * grid_size

    # Fold per-anchor scaling into the w/h logits: exp(w + log a) == exp(w) * a
    anchor_w = jnp.asarray([a[0] for a in scaled_anchors], jnp.float32)
    anchor_h = jnp.asarray([a[1] for a in scaled_anchors], jnp.float32)
    anchor_bias = jnp.zeros((1, num_anchors, 1, 1, depth), jnp.float32)
    anchor_bias = anchor_bias.at[0, :, 0, 0, 2].set(jnp.log(anchor_w))
    anchor_bias = anchor_bias.at[0, :, 0, 0, 3].set(jnp.log(anchor_h))
    pred_adj = pred.astype(jnp.float32) + anchor_bias

    # Channel-major flat layouts.
    # TODO(synk): pred pays one (N, D) -> (D, N) relayout here; a native-layout
    # kernel variant would remove it (largest relative win on v5e).
    pred_dn = pred_adj.reshape(n_flat, depth).T                       # (D, N)
    tgt_dn = jnp.concatenate([                                        # (6+C, N) f32
        tx.reshape(1, n_flat), ty.reshape(1, n_flat),
        tw.reshape(1, n_flat), th.reshape(1, n_flat),
        tconf.reshape(1, n_flat),
        tcls_cm.reshape(num_classes, n_flat),      # built channel-major: no transpose
        noobj_mask.reshape(1, n_flat),
    ], axis=0)

    # --- tiling: lane-dense (rows, S, 128); tile_s VMEM-budgeted for v7x -----
    lane = 128
    s = pl.cdiv(n_flat, lane)
    s8 = ((s + 7) // 8) * 8
    pred_bytes = jnp.dtype(pred_dtype).itemsize
    # double-buffered input windows per sublane row of tile (pred bf16, tgt f32)
    bytes_per_srow = 2 * lane * (depth * pred_bytes + (6 + num_classes) * 4)
    vmem_budget = 24 * 1024 * 1024     # headroom under v7x 64 MiB / 32 MiB scoped
    tile_cap = max(8, min(512, (vmem_budget // bytes_per_srow) // 8 * 8))
    overlap_cap = max(8, (s8 // 8) // 8 * 8)         # aim for ~>=8 grid steps
    tile_s = max(8, min(tile_cap, s8, max(overlap_cap, 128)))

    num_tiles = pl.cdiv(s, tile_s)
    num_tiles = ((num_tiles + _NUM_CORE_SPLITS - 1)
                 // _NUM_CORE_SPLITS) * _NUM_CORE_SPLITS
    tiles_per_core = num_tiles // _NUM_CORE_SPLITS
    s_pad = num_tiles * tile_s
    n_pad = s_pad * lane

    def to_tiles(arr_2d, dtype):
        arr_2d = jnp.pad(arr_2d, ((0, 0), (0, n_pad - n_flat)))
        return arr_2d.reshape(arr_2d.shape[0], s_pad, lane).astype(dtype)

    # Per-tile obj counts (scalar prefetch) + global normalizers (wrapper side).
    obj_flat = obj_mask.reshape(n_flat)
    obj_pad = jnp.pad(obj_flat, (0, n_pad - n_flat))
    obj_cnt = jnp.sum(obj_pad.reshape(num_tiles, tile_s * lane),
                      axis=-1).astype(jnp.int32)
    # max(n, 1) guard only changes the degenerate empty case (reference -> NaN).
    n_obj = jnp.maximum(jnp.sum(obj_flat), 1.0)
    n_noobj = jnp.maximum(jnp.sum(noobj_mask), 1.0)

    partials = _run_loss_kernel(obj_cnt,
                                to_tiles(pred_dn, pred_dtype),
                                to_tiles(tgt_dn, jnp.float32),
                                tile_s, tiles_per_core)
    sums = jnp.sum(partials, axis=(0, 2, 3))          # (4,) tiny XLA epilogue
    loss = (5.0 * sums[0] / n_obj                     # 5*(lx + ly + lw + lh)
            + sums[1] / n_obj                         # obj_scale = 1
            + 0.5 * sums[2] / n_noobj                 # noobj_scale = 0.5
            + sums[3] / (n_obj * num_classes))        # cls BCE mean
    return loss


if __name__ == "__main__":
    num_classes = 4
    anchors = [(10.0, 13.0), (16.0, 30.0), (33.0, 23.0)]
    image_size = 64
    batch_size = 2
    num_anchors = len(anchors)
    grid_size = 8
    depth = 5 + num_classes

    key = jax.random.PRNGKey(0)
    pred = 0.5 * jax.random.normal(
        key, (batch_size, num_anchors, grid_size, grid_size, depth),
        dtype=jnp.float32)

    # targets: (T, 6) = [batch_idx, class, x, y, w, h] normalized to [0, 1]
    targets = jnp.array([
        [0.0, 1.0, 0.30, 0.40, 0.20, 0.30],
        [0.0, 3.0, 0.70, 0.60, 0.40, 0.35],
        [1.0, 0.0, 0.50, 0.50, 0.25, 0.50],
        [1.0, 2.0, 0.15, 0.85, 0.10, 0.12],
    ], dtype=jnp.float32)

    loss_fn = functools.partial(
        yolov3_loss, anchors=anchors, image_size=image_size,
        num_classes=num_classes, ignore_thresh=0.5)

    loss = jax.jit(loss_fn)(pred, targets)
    jax.block_until_ready(loss)
    assert jnp.isfinite(loss), f"non-finite loss: {loss}"
    print("KERNEL_OK")
</pallas_src>

<mosaic_0001>
module attributes {stable_mosaic.version = 11 : i64} {
  func.func @_yolo_loss_kernel(%arg0: i32, %arg1: i32, %arg2: memref<2xi32, #tpu.memory_space<smem>>, %arg3: memref<9x8x128xbf16, #tpu.memory_space<vmem>>, %arg4: memref<10x8x128xf32, #tpu.memory_space<vmem>>, %arg5: memref<1x4x8x128xf32, #tpu.memory_space<vmem>>) attributes {dimension_semantics = [#tpu.dimension_semantics<parallel>, #tpu.dimension_semantics<arbitrary>], iteration_bounds = array<i64: 2, 1>, scalar_prefetch = 1 : i64, scratch_operands = 0 : i64, tpu.core_type = #tpu.core_type<tc>, window_params = [{transform_indices = @transform_0, window_bounds = array<i64: 9, 8, 128>}, {transform_indices = @transform_1, window_bounds = array<i64: 10, 8, 128>}, {transform_indices = @transform_2, window_bounds = array<i64: 1, 4, 8, 128>}]} {
    %c1_i32 = arith.constant 1 : i32
    %0 = arith.muli %arg0, %c1_i32 : i32
    %1 = arith.addi %0, %arg1 : i32
    %c0_i32 = arith.constant 0 : i32
    %2 = arith.cmpi eq, %arg1, %c0_i32 : i32
    %3 = arith.extui %2 : i1 to i32
    %c0_i32_0 = arith.constant 0 : i32
    %4 = arith.cmpi ne, %3, %c0_i32_0 : i32
    scf.if %4 {
      %cst_19 = arith.constant 0.000000e+00 : f32
      %38 = vector.broadcast %cst_19 : f32 to vector<1x4x8x128xf32>
      %c0_20 = arith.constant 0 : index
      %c0_21 = arith.constant 0 : index
      %c0_22 = arith.constant 0 : index
      %c0_23 = arith.constant 0 : index
      %39 = vector.load %arg5[%c0_20, %c0_21, %c0_22, %c0_23] : memref<1x4x8x128xf32, #tpu.memory_space<vmem>>, vector<1x4x8x128xf32>
      tpu.vector_store %arg5[%c0_20, %c0_21, %c0_22, %c0_23], %38 {strides = array<i32>} : memref<1x4x8x128xf32, #tpu.memory_space<vmem>>, vector<1x4x8x128xf32>,
    } else {
    }
    %c4 = arith.constant 4 : index
    %c0 = arith.constant 0 : index
    %c0_1 = arith.constant 0 : index
    %5 = vector.load %arg3[%c4, %c0, %c0_1] : memref<9x8x128xbf16, #tpu.memory_space<vmem>>, vector<1x8x128xbf16>
    %6 = vector.shape_cast %5 : vector<1x8x128xbf16> to vector<8x128xbf16>
    %7 = arith.extf %6 : vector<8x128xbf16> to vector<8x128xf32>
    %c4_2 = arith.constant 4 : index
    %c0_3 = arith.constant 0 : index
    %c0_4 = arith.constant 0 : index
    %8 = vector.load %arg4[%c4_2, %c0_3, %c0_4] : memref<10x8x128xf32, #tpu.memory_space<vmem>>, vector<1x8x128xf32>
    %9 = vector.shape_cast %8 : vector<1x8x128xf32> to vector<8x128xf32>
    %c9 = arith.constant 9 : index
    %c0_5 = arith.constant 0 : index
    %c0_6 = arith.constant 0 : index
    %10 = vector.load %arg4[%c9, %c0_5, %c0_6] : memref<10x8x128xf32, #tpu.memory_space<vmem>>, vector<1x8x128xf32>
    %11 = vector.shape_cast %10 : vector<1x8x128xf32> to vector<8x128xf32>
    %cst = arith.constant 0.000000e+00 : f32
    %12 = vector.broadcast %cst : f32 to vector<8x128xf32>
    %13 = arith.maximumf %7, %12 : vector<8x128xf32>
    %14 = arith.mulf %7, %9 : vector<8x128xf32>
    %15 = arith.subf %13, %14 : vector<8x128xf32>
    %16 = math.absf %7 : vector<8x128xf32>
    %cst_7 = arith.constant 0.000000e+00 : f32
    %17 = vector.broadcast %cst_7 : f32 to vector<8x128xf32>
    %18 = arith.subf %17, %16 : vector<8x128xf32>
    %19 = math.exp %18 : vector<8x128xf32>
    %cst_8 = arith.constant 1.000000e+00 : f32
    %20 = vector.broadcast %cst_8 : f32 to vector<8x128xf32>
    %21 = arith.addf %20, %19 : vector<8x128xf32>
    %22 = math.log %21 : vector<8x128xf32>
    %23 = arith.addf %15, %22 : vector<8x128xf32>
    %c0_9 = arith.constant 0 : index
    %c2 = arith.constant 2 : index
    %c0_10 = arith.constant 0 : index
    %c0_11 = arith.constant 0 : index
    %24 = vector.load %arg5[%c0_9, %c2, %c0_10, %c0_11] : memref<1x4x8x128xf32, #tpu.memory_space<vmem>>, vector<1x1x8x128xf32>
    %25 = vector.shape_cast %24 : vector<1x1x8x128xf32> to vector<8x128xf32>
    %26 = arith.mulf %11, %23 : vector<8x128xf32>
    %27 = vector.shape_cast %26 : vector<8x128xf32> to vector<1x8x128xf32>
    %cst_12 = arith.constant dense<0.000000e+00> : vector<8x128xf32>
    %28 = vector.multi_reduction <add>, %27, %cst_12 [0] : vector<1x8x128xf32> to vector<8x128xf32>
    %29 = arith.addf %25, %28 : vector<8x128xf32>
    %c0_13 = arith.constant 0 : index
    %c2_14 = arith.constant 2 : index
    %c0_15 = arith.constant 0 : index
    %c0_16 = arith.constant 0 : index
    %30 = vector.load %arg5[%c0_13, %c2_14, %c0_15, %c0_16] : memref<1x4x8x128xf32, #tpu.memory_space<vmem>>, vector<1x1x8x128xf32>
    %31 = vector.shape_cast %30 : vector<1x1x8x128xf32> to vector<8x128xf32>
    %32 = vector.shape_cast %29 : vector<8x128xf32> to vector<1x1x8x128xf32>
    tpu.vector_store %arg5[%c0_13, %c2_14, %c0_15, %c0_16], %32 {strides = array<i32>} : memref<1x4x8x128xf32, #tpu.memory_space<vmem>>, vector<1x1x8x128xf32>,
    %33 = arith.index_cast %1 : i32 to index
    %34 = memref.load %arg2[%33] : memref<2xi32, #tpu.memory_space<smem>>
    %c0_i32_17 = arith.constant 0 : i32
    %35 = arith.cmpi sgt, %34, %c0_i32_17 : i32
    %36 = arith.extui %35 : i1 to i32
    %c0_i32_18 = arith.constant 0 : i32
    %37 = arith.cmpi ne, %36, %c0_i32_18 : i32
    scf.if %37 {
      %c0_19 = arith.constant 0 : index
      %c0_20 = arith.constant 0 : index
      %c0_21 = arith.constant 0 : index
      %38 = vector.load %arg3[%c0_19, %c0_20, %c0_21] : memref<9x8x128xbf16, #tpu.memory_space<vmem>>, vector<1x8x128xbf16>
      %39 = vector.shape_cast %38 : vector<1x8x128xbf16> to vector<8x128xbf16>
      %40 = arith.extf %39 : vector<8x128xbf16> to vector<8x128xf32>
      %cst_22 = arith.constant 5.000000e-01 : f32
      %41 = vector.broadcast %cst_22 : f32 to vector<8x128xf32>
      %42 = arith.mulf %41, %40 : vector<8x128xf32>
      %43 = math.tanh %42 : vector<8x128xf32>
      %cst_23 = arith.constant 5.000000e-01 : f32
      %44 = vector.broadcast %cst_23 : f32 to vector<8x128xf32>
      %45 = arith.mulf %44, %43 : vector<8x128xf32>
      %cst_24 = arith.constant 5.000000e-01 : f32
      %46 = vector.broadcast %cst_24 : f32 to vector<8x128xf32>
      %47 = arith.addf %45, %46 : vector<8x128xf32>
      %c1 = arith.constant 1 : index
      %c0_25 = arith.constant 0 : index
      %c0_26 = arith.constant 0 : index
      %48 = vector.load %arg3[%c1, %c0_25, %c0_26] : memref<9x8x128xbf16, #tpu.memory_space<vmem>>, vector<1x8x128xbf16>
      %49 = vector.shape_cast %48 : vector<1x8x128xbf16> to vector<8x128xbf16>
      %50 = arith.extf %49 : vector<8x128xbf16> to vector<8x128xf32>
      %cst_27 = arith.constant 5.000000e-01 : f32
      %51 = vector.broadcast %cst_27 : f32 to vector<8x128xf32>
      %52 = arith.mulf %51, %50 : vector<8x128xf32>
      %53 = math.tanh %52 : vector<8x128xf32>
      %cst_28 = arith.constant 5.000000e-01 : f32
      %54 = vector.broadcast %cst_28 : f32 to vector<8x128xf32>
      %55 = arith.mulf %54, %53 : vector<8x128xf32>
      %cst_29 = arith.constant 5.000000e-01 : f32
      %56 = vector.broadcast %cst_29 : f32 to vector<8x128xf32>
      %57 = arith.addf %55, %56 : vector<8x128xf32>
      %c2_30 = arith.constant 2 : index
      %c0_31 = arith.constant 0 : index
      %c0_32 = arith.constant 0 : index
      %58 = vector.load %arg3[%c2_30, %c0_31, %c0_32] : memref<9x8x128xbf16, #tpu.memory_space<vmem>>, vector<1x8x128xbf16>
      %59 = vector.shape_cast %58 : vector<1x8x128xbf16> to vector<8x128xbf16>
      %60 = arith.extf %59 : vector<8x128xbf16> to vector<8x128xf32>
      %61 = math.exp %60 : vector<8x128xf32>
      %c3 = arith.constant 3 : index
      %c0_33 = arith.constant 0 : index
      %c0_34 = arith.constant 0 : index
      %62 = vector.load %arg3[%c3, %c0_33, %c0_34] : memref<9x8x128xbf16, #tpu.memory_space<vmem>>, vector<1x8x128xbf16>
      %63 = vector.shape_cast %62 : vector<1x8x128xbf16> to vector<8x128xbf16>
      %64 = arith.extf %63 : vector<8x128xbf16> to vector<8x128xf32>
      %65 = math.exp %64 : vector<8x128xf32>
      %c0_35 = arith.constant 0 : index
      %c0_36 = arith.constant 0 : index
      %c0_37 = arith.constant 0 : index
      %66 = vector.load %arg4[%c0_35, %c0_36, %c0_37] : memref<10x8x128xf32, #tpu.memory_space<vmem>>, vector<1x8x128xf32>
      %67 = vector.shape_cast %66 : vector<1x8x128xf32> to vector<8x128xf32>
      %68 = arith.subf %47, %67 : vector<8x128xf32>
      %69 = arith.mulf %68, %68 : vector<8x128xf32>
      %c1_38 = arith.constant 1 : index
      %c0_39 = arith.constant 0 : index
      %c0_40 = arith.constant 0 : index
      %70 = vector.load %arg4[%c1_38, %c0_39, %c0_40] : memref<10x8x128xf32, #tpu.memory_space<vmem>>, vector<1x8x128xf32>
      %71 = vector.shape_cast %70 : vector<1x8x128xf32> to vector<8x128xf32>
      %72 = arith.subf %57, %71 : vector<8x128xf32>
      %73 = arith.mulf %72, %72 : vector<8x128xf32>
      %74 = arith.addf %69, %73 : vector<8x128xf32>
      %c2_41 = arith.constant 2 : index
      %c0_42 = arith.constant 0 : index
      %c0_43 = arith.constant 0 : index
      %75 = vector.load %arg4[%c2_41, %c0_42, %c0_43] : memref<10x8x128xf32, #tpu.memory_space<vmem>>, vector<1x8x128xf32>
      %76 = vector.shape_cast %75 : vector<1x8x128xf32> to vector<8x128xf32>
      %77 = arith.subf %61, %76 : vector<8x128xf32>
      %78 = arith.mulf %77, %77 : vector<8x128xf32>
      %79 = arith.addf %74, %78 : vector<8x128xf32>
      %c3_44 = arith.constant 3 : index
      %c0_45 = arith.constant 0 : index
      %c0_46 = arith.constant 0 : index
      %80 = vector.load %arg4[%c3_44, %c0_45, %c0_46] : memref<10x8x128xf32, #tpu.memory_space<vmem>>, vector<1x8x128xf32>
      %81 = vector.shape_cast %80 : vector<1x8x128xf32> to vector<8x128xf32>
      %82 = arith.subf %65, %81 : vector<8x128xf32>
      %83 = arith.mulf %82, %82 : vector<8x128xf32>
      %84 = arith.addf %79, %83 : vector<8x128xf32>
      %c0_47 = arith.constant 0 : index
      %c0_48 = arith.constant 0 : index
      %c0_49 = arith.constant 0 : index
      %c0_50 = arith.constant 0 : index
      %85 = vector.load %arg5[%c0_47, %c0_48, %c0_49, %c0_50] : memref<1x4x8x128xf32, #tpu.memory_space<vmem>>, vector<1x1x8x128xf32>
      %86 = vector.shape_cast %85 : vector<1x1x8x128xf32> to vector<8x128xf32>
      %cst_51 = arith.constant 0.000000e+00 : f32
      %87 = vector.broadcast %cst_51 : f32 to vector<8x128xf32>
      %88 = arith.cmpf ogt, %9, %87 : vector<8x128xf32>
      %cst_52 = arith.constant 0.000000e+00 : f32
      %89 = vector.broadcast %cst_52 : f32 to vector<8x128xf32>
      %90 = arith.select %88, %84, %89 : vector<8x128xi1>, vector<8x128xf32>
      %91 = vector.shape_cast %90 : vector<8x128xf32> to vector<1x8x128xf32>
      %cst_53 = arith.constant dense<0.000000e+00> : vector<8x128xf32>
      %92 = vector.multi_reduction <add>, %91, %cst_53 [0] : vector<1x8x128xf32> to vector<8x128xf32>
      %93 = arith.addf %86, %92 : vector<8x128xf32>
      %c0_54 = arith.constant 0 : index
      %c0_55 = arith.constant 0 : index
      %c0_56 = arith.constant 0 : index
      %c0_57 = arith.constant 0 : index
      %94 = vector.load %arg5[%c0_54, %c0_55, %c0_56, %c0_57] : memref<1x4x8x128xf32, #tpu.memory_space<vmem>>, vector<1x1x8x128xf32>
      %95 = vector.shape_cast %94 : vector<1x1x8x128xf32> to vector<8x128xf32>
      %96 = vector.shape_cast %93 : vector<8x128xf32> to vector<1x1x8x128xf32>
      tpu.vector_store %arg5[%c0_54, %c0_55, %c0_56, %c0_57], %96 {strides = array<i32>} : memref<1x4x8x128xf32, #tpu.memory_space<vmem>>, vector<1x1x8x128xf32>,
      %c0_58 = arith.constant 0 : index
      %c1_59 = arith.constant 1 : index
      %c0_60 = arith.constant 0 : index
      %c0_61 = arith.constant 0 : index
      %97 = vector.load %arg5[%c0_58, %c1_59, %c0_60, %c0_61] : memref<1x4x8x128xf32, #tpu.memory_space<vmem>>, vector<1x1x8x128xf32>
      %98 = vector.shape_cast %97 : vector<1x1x8x128xf32> to vector<8x128xf32>
      %99 = arith.mulf %9, %23 : vector<8x128xf32>
      %100 = vector.shape_cast %99 : vector<8x128xf32> to vector<1x8x128xf32>
      %cst_62 = arith.constant dense<0.000000e+00> : vector<8x128xf32>
      %101 = vector.multi_reduction <add>, %100, %cst_62 [0] : vector<1x8x128xf32> to vector<8x128xf32>
      %102 = arith.addf %98, %101 : vector<8x128xf32>
      %c0_63 = arith.constant 0 : index
      %c1_64 = arith.constant 1 : index
      %c0_65 = arith.constant 0 : index
      %c0_66 = arith.constant 0 : index
      %103 = vector.load %arg5[%c0_63, %c1_64, %c0_65, %c0_66] : memref<1x4x8x128xf32, #tpu.memory_space<vmem>>, vector<1x1x8x128xf32>
      %104 = vector.shape_cast %103 : vector<1x1x8x128xf32> to vector<8x128xf32>
      %105 = vector.shape_cast %102 : vector<8x128xf32> to vector<1x1x8x128xf32>
      tpu.vector_store %arg5[%c0_63, %c1_64, %c0_65, %c0_66], %105 {strides = array<i32>} : memref<1x4x8x128xf32, #tpu.memory_space<vmem>>, vector<1x1x8x128xf32>,
      %cst_67 = arith.constant 0.000000e+00 : f32
      %106 = vector.broadcast %cst_67 : f32 to vector<8x128xf32>
      %c0_i32_68 = arith.constant 0 : i32
      %c5_i32 = arith.constant 5 : i32
      %107 = arith.addi %c5_i32, %c0_i32_68 : i32
      %108 = arith.index_cast %107 : i32 to index
      %c0_69 = arith.constant 0 : index
      %c0_70 = arith.constant 0 : index
      %109 = vector.load %arg3[%108, %c0_69, %c0_70] : memref<9x8x128xbf16, #tpu.memory_space<vmem>>, vector<1x8x128xbf16>
      %110 = vector.shape_cast %109 : vector<1x8x128xbf16> to vector<8x128xbf16>
      %111 = arith.extf %110 : vector<8x128xbf16> to vector<8x128xf32>
      %c5_i32_71 = arith.constant 5 : i32
      %112 = arith.addi %c5_i32_71, %c0_i32_68 : i32
      %113 = arith.index_cast %112 : i32 to index
      %c0_72 = arith.constant 0 : index
      %c0_73 = arith.constant 0 : index
      %114 = vector.load %arg4[%113, %c0_72, %c0_73] : memref<10x8x128xf32, #tpu.memory_space<vmem>>, vector<1x8x128xf32>
      %115 = vector.shape_cast %114 : vector<1x8x128xf32> to vector<8x128xf32>
      %cst_74 = arith.constant 0.000000e+00 : f32
      %116 = vector.broadcast %cst_74 : f32 to vector<8x128xf32>
      %117 = arith.maximumf %111, %116 : vector<8x128xf32>
      %118 = arith.mulf %111, %115 : vector<8x128xf32>
      %119 = arith.subf %117, %118 : vector<8x128xf32>
      %120 = math.absf %111 : vector<8x128xf32>
      %cst_75 = arith.constant 0.000000e+00 : f32
      %121 = vector.broadcast %cst_75 : f32 to vector<8x128xf32>
      %122 = arith.subf %121, %120 : vector<8x128xf32>
      %123 = math.exp %122 : vector<8x128xf32>
      %cst_76 = arith.constant 1.000000e+00 : f32
      %124 = vector.broadcast %cst_76 : f32 to vector<8x128xf32>
      %125 = arith.addf %124, %123 : vector<8x128xf32>
      %126 = math.log %125 : vector<8x128xf32>
      %127 = arith.addf %119, %126 : vector<8x128xf32>
      %128 = arith.addf %106, %127 : vector<8x128xf32>
      %c1_i32_77 = arith.constant 1 : i32
      %c5_i32_78 = arith.constant 5 : i32
      %129 = arith.addi %c5_i32_78, %c1_i32_77 : i32
      %130 = arith.index_cast %129 : i32 to index
      %c0_79 = arith.constant 0 : index
      %c0_80 = arith.constant 0 : index
      %131 = vector.load %arg3[%130, %c0_79, %c0_80] : memref<9x8x128xbf16, #tpu.memory_space<vmem>>, vector<1x8x128xbf16>
      %132 = vector.shape_cast %131 : vector<1x8x128xbf16> to vector<8x128xbf16>
      %133 = arith.extf %132 : vector<8x128xbf16> to vector<8x128xf32>
      %c5_i32_81 = arith.constant 5 : i32
      %134 = arith.addi %c5_i32_81, %c1_i32_77 : i32
      %135 = arith.index_cast %134 : i32 to index
      %c0_82 = arith.constant 0 : index
      %c0_83 = arith.constant 0 : index
      %136 = vector.load %arg4[%135, %c0_82, %c0_83] : memref<10x8x128xf32, #tpu.memory_space<vmem>>, vector<1x8x128xf32>
      %137 = vector.shape_cast %136 : vector<1x8x128xf32> to vector<8x128xf32>
      %cst_84 = arith.constant 0.000000e+00 : f32
      %138 = vector.broadcast %cst_84 : f32 to vector<8x128xf32>
      %139 = arith.maximumf %133, %138 : vector<8x128xf32>
      %140 = arith.mulf %133, %137 : vector<8x128xf32>
      %141 = arith.subf %139, %140 : vector<8x128xf32>
      %142 = math.absf %133 : vector<8x128xf32>
      %cst_85 = arith.constant 0.000000e+00 : f32
      %143 = vector.broadcast %cst_85 : f32 to vector<8x128xf32>
      %144 = arith.subf %143, %142 : vector<8x128xf32>
      %145 = math.exp %144 : vector<8x128xf32>
      %cst_86 = arith.constant 1.000000e+00 : f32
      %146 = vector.broadcast %cst_86 : f32 to vector<8x128xf32>
      %147 = arith.addf %146, %145 : vector<8x128xf32>
      %148 = math.log %147 : vector<8x128xf32>
      %149 = arith.addf %141, %148 : vector<8x128xf32>
      %150 = arith.addf %128, %149 : vector<8x128xf32>
      %c2_i32 = arith.constant 2 : i32
      %c5_i32_87 = arith.constant 5 : i32
      %151 = arith.addi %c5_i32_87, %c2_i32 : i32
      %152 = arith.index_cast %151 : i32 to index
      %c0_88 = arith.constant 0 : index
      %c0_89 = arith.constant 0 : index
      %153 = vector.load %arg3[%152, %c0_88, %c0_89] : memref<9x8x128xbf16, #tpu.memory_space<vmem>>, vector<1x8x128xbf16>
      %154 = vector.shape_cast %153 : vector<1x8x128xbf16> to vector<8x128xbf16>
      %155 = arith.extf %154 : vector<8x128xbf16> to vector<8x128xf32>
      %c5_i32_90 = arith.constant 5 : i32
      %156 = arith.addi %c5_i32_90, %c2_i32 : i32
      %157 = arith.index_cast %156 : i32 to index
      %c0_91 = arith.constant 0 : index
      %c0_92 = arith.constant 0 : index
      %158 = vector.load %arg4[%157, %c0_91, %c0_92] : memref<10x8x128xf32, #tpu.memory_space<vmem>>, vector<1x8x128xf32>
      %159 = vector.shape_cast %158 : vector<1x8x128xf32> to vector<8x128xf32>
      %cst_93 = arith.constant 0.000000e+00 : f32
      %160 = vector.broadcast %cst_93 : f32 to vector<8x128xf32>
      %161 = arith.maximumf %155, %160 : vector<8x128xf32>
      %162 = arith.mulf %155, %159 : vector<8x128xf32>
      %163 = arith.subf %161, %162 : vector<8x128xf32>
      %164 = math.absf %155 : vector<8x128xf32>
      %cst_94 = arith.constant 0.000000e+00 : f32
      %165 = vector.broadcast %cst_94 : f32 to vector<8x128xf32>
      %166 = arith.subf %165, %164 : vector<8x128xf32>
      %167 = math.exp %166 : vector<8x128xf32>
      %cst_95 = arith.constant 1.000000e+00 : f32
      %168 = vector.broadcast %cst_95 : f32 to vector<8x128xf32>
      %169 = arith.addf %168, %167 : vector<8x128xf32>
      %170 = math.log %169 : vector<8x128xf32>
      %171 = arith.addf %163, %170 : vector<8x128xf32>
      %172 = arith.addf %150, %171 : vector<8x128xf32>
      %c3_i32 = arith.constant 3 : i32
      %c5_i32_96 = arith.constant 5 : i32
      %173 = arith.addi %c5_i32_96, %c3_i32 : i32
      %174 = arith.index_cast %173 : i32 to index
      %c0_97 = arith.constant 0 : index
      %c0_98 = arith.constant 0 : index
      %175 = vector.load %arg3[%174, %c0_97, %c0_98] : memref<9x8x128xbf16, #tpu.memory_space<vmem>>, vector<1x8x128xbf16>
      %176 = vector.shape_cast %175 : vector<1x8x128xbf16> to vector<8x128xbf16>
      %177 = arith.extf %176 : vector<8x128xbf16> to vector<8x128xf32>
      %c5_i32_99 = arith.constant 5 : i32
      %178 = arith.addi %c5_i32_99, %c3_i32 : i32
      %179 = arith.index_cast %178 : i32 to index
      %c0_100 = arith.constant 0 : index
      %c0_101 = arith.constant 0 : index
      %180 = vector.load %arg4[%179, %c0_100, %c0_101] : memref<10x8x128xf32, #tpu.memory_space<vmem>>, vector<1x8x128xf32>
      %181 = vector.shape_cast %180 : vector<1x8x128xf32> to vector<8x128xf32>
      %cst_102 = arith.constant 0.000000e+00 : f32
      %182 = vector.broadcast %cst_102 : f32 to vector<8x128xf32>
      %183 = arith.maximumf %177, %182 : vector<8x128xf32>
      %184 = arith.mulf %177, %181 : vector<8x128xf32>
      %185 = arith.subf %183, %184 : vector<8x128xf32>
      %186 = math.absf %177 : vector<8x128xf32>
      %cst_103 = arith.constant 0.000000e+00 : f32
      %187 = vector.broadcast %cst_103 : f32 to vector<8x128xf32>
      %188 = arith.subf %187, %186 : vector<8x128xf32>
      %189 = math.exp %188 : vector<8x128xf32>
      %cst_104 = arith.constant 1.000000e+00 : f32
      %190 = vector.broadcast %cst_104 : f32 to vector<8x128xf32>
      %191 = arith.addf %190, %189 : vector<8x128xf32>
      %192 = math.log %191 : vector<8x128xf32>
      %193 = arith.addf %185, %192 : vector<8x128xf32>
      %194 = arith.addf %172, %193 : vector<8x128xf32>
      %c4_i32 = arith.constant 4 : i32
      %c0_105 = arith.constant 0 : index
      %c3_106 = arith.constant 3 : index
      %c0_107 = arith.constant 0 : index
      %c0_108 = arith.constant 0 : index
      %195 = vector.load %arg5[%c0_105, %c3_106, %c0_107, %c0_108] : memref<1x4x8x128xf32, #tpu.memory_space<vmem>>, vector<1x1x8x128xf32>
      %196 = vector.shape_cast %195 : vector<1x1x8x128xf32> to vector<8x128xf32>
      %197 = arith.mulf %9, %194 : vector<8x128xf32>
      %198 = vector.shape_cast %197 : vector<8x128xf32> to vector<1x8x128xf32>
      %cst_109 = arith.constant dense<0.000000e+00> : vector<8x128xf32>
      %199 = vector.multi_reduction <add>, %198, %cst_109 [0] : vector<1x8x128xf32> to vector<8x128xf32>
      %200 = arith.addf %196, %199 : vector<8x128xf32>
      %c0_110 = arith.constant 0 : index
      %c3_111 = arith.constant 3 : index
      %c0_112 = arith.constant 0 : index
      %c0_113 = arith.constant 0 : index
      %201 = vector.load %arg5[%c0_110, %c3_111, %c0_112, %c0_113] : memref<1x4x8x128xf32, #tpu.memory_space<vmem>>, vector<1x1x8x128xf32>
      %202 = vector.shape_cast %201 : vector<1x1x8x128xf32> to vector<8x128xf32>
      %203 = vector.shape_cast %200 : vector<8x128xf32> to vector<1x1x8x128xf32>
      tpu.vector_store %arg5[%c0_110, %c3_111, %c0_112, %c0_113], %203 {strides = array<i32>} : memref<1x4x8x128xf32, #tpu.memory_space<vmem>>, vector<1x1x8x128xf32>,
    } else {
    }
    return
  }
  func.func @transform_0(%arg0: i32, %arg1: i32, %arg2: memref<2xi32, #tpu.memory_space<smem>>) -> (i32, i32, i32) {
    %c1_i32 = arith.constant 1 : i32
    %0 = arith.muli %arg0, %c1_i32 : i32
    %1 = arith.addi %0, %arg1 : i32
    %c0_i32 = arith.constant 0 : i32
    %c0_i32_0 = arith.constant 0 : i32
    %c0_i32_1 = arith.constant 0 : i32
    return %c0_i32, %1, %c0_i32_0 : i32, i32, i32
  }
  func.func @transform_1(%arg0: i32, %arg1: i32, %arg2: memref<2xi32, #tpu.memory_space<smem>>) -> (i32, i32, i32) {
    %c1_i32 = arith.constant 1 : i32
    %0 = arith.muli %arg0, %c1_i32 : i32
    %1 = arith.addi %0, %arg1 : i32
    %c0_i32 = arith.constant 0 : i32
    %c0_i32_0 = arith.constant 0 : i32
    %c0_i32_1 = arith.constant 0 : i32
    return %c0_i32, %1, %c0_i32_0 : i32, i32, i32
  }
  func.func @transform_2(%arg0: i32, %arg1: i32, %arg2: memref<2xi32, #tpu.memory_space<smem>>) -> (i32, i32, i32, i32) {
    %c0_i32 = arith.constant 0 : i32
    %c0_i32_0 = arith.constant 0 : i32
    %c0_i32_1 = arith.constant 0 : i32
    %c0_i32_2 = arith.constant 0 : i32
    return %arg0, %c0_i32, %c0_i32_0, %c0_i32_1 : i32, i32, i32, i32
  }
}

</mosaic_0001>

<bundles_post_ra>
// kernel: yolov3_loss.1
= control target key start
LH: loop header
LB: loop body
LE: loop exit
PB: predicated region body
PF: predicated region fallthrough
CT: control target
= control target key end

     0   :  { %s925_s0 = inlined_call_operand.vmem [shape: s32[2], index: 0, kind: input, shape index: {}]   ;;  %s926_s1 = inlined_call_operand.vmem [shape: bf16[9,16,128], index: 1, kind: input, shape index: {}]   ;;  %s927_s2 = inlined_call_operand.vmem [shape: f32[10,16,128], index: 2, kind: input, shape index: {}]   ;;  %s928_s3 = inlined_call_operand.vmem [shape: f32[2,4,8,128], index: 3, kind: output, shape index: {}]  }
   0x1   :  { %s8_s14 = sshll.u32 %s925_s0, 4  ;;  %s9_s14 = int_to_ptr.vmem [resolvable:$true] %s8_s14 }
   0x2   :  { %s706_s15 = scalar_lea.vmem %s9_s14, 16  ;;  %p711_p1 = scmp.lt.s32.totalorder %s9_s14, %s9_s14 }
   0x3   :  { %p707_p0 = scmp.ne.s32.totalorder %s9_s14, %s706_s15  ;;  %p712_p2 = scmp.lt.s32.totalorder %s706_s15, %s706_s15 }
   0x5   :  { %p713_p3 = por %p712_p2, %p711_p1 }
   0x7   :  { %p714_p4 = pnand %p713_p3, %p707_p0 }
   0x9   :  { %717 = shalt.err (!%p714_p4)  }
   0xa   :  { %s760_s16 = smov [#allocation3]  }
   0xb   :  { %11 = dma.vmem_to_smem %s9_s14, 16, %s760_s16, [#allocation2] }
   0xc   :  { %738 = dma.done.wait [#allocation2], 16 }
   0xd   :  { %739 = vsyncadd [#allocation2], 4294967280 }
   0xe   :  { %13 = sfence }
   0xf   :  { %s785_s17 = smov 0   ;;  %s787_s18 = smov 0  }
  0x10   :  { %s789_s19 = smov 0   ;;  %s791_s0 = smov 0  }
  0x11   :  { %s793_s20 = smov 0  }
  0x12 LB: > { %s31_s21 = sadd.s32 1, %s754_s0  ;;  %p47_p6 = scmp.ne.s32.totalorder %s746_s18, %s742_s17  ;;  %s758_s20 = sphi %s793_s20, %s19_s20   ;;  %s754_s0 = sphi %s791_s0, %s933_s0   ;;  %s750_s19 = sphi %s789_s19, %s932_s19   ;;  %s746_s18 = sphi %s787_s18, %s931_s18   ;;  %s742_s17 = sphi %s785_s17, %s930_s17  }
  0x13   : > { %p33_p5 = scmp.ge.s32.totalorder %s31_s21, 2  ;;  %p48_p7 = scmp.eq.s32.totalorder %s758_s20, 0 }
  0x14   : > { %s40_s24 = sadd.s32 1, %s746_s18  ;;  %p594_p10 = scmp.ge.s32.totalorder %s758_s20, 2 }
  0x15   : > { %s935_s21 = smov (%p33_p5, %s31_s21), 0  ;;  %p816_p8 = por %p48_p7, %p47_p6 }
  0x16   : > { %s37_s23 = ssub.s32 %s754_s0, %s935_s21  ;;  %127 = sbr.rel (%p594_p10) target bundleno = 46 (0x2e), region = 16 }
  0x17   : > { %p38_p9 = scmp.eq.s32.totalorder %s37_s23, 0 }
  0x19   : > { %s824_s25 = scalar_select %p38_p9, %s746_s18, %s40_s24  }
  0x1b   : > { %130 = sbr.rel (!%p816_p8) target bundleno = 37 (0x25), region = 20  ;;  %s132_s26 = sand.u32 (%p816_p8), 1, %s746_s18  }
  0x1c   : > { %s595_s27 = sshll.u32 (%p816_p8), %s754_s0, 2  ;;  %s632_s28 = smul.u32 (%p816_p8), 36, %s132_s26 }
  0x1d   : > { %s137_s4 = scalar_lea.vmem (%p816_p8), %s926_s1, %s595_s27 }
  0x1e   : > { %v154_v0 = vld [vmem:[%s137_s4] sm:$0xf] (%p816_p8)  ;;  %v156_v1 = vld [vmem:[%s137_s4 + $0x8] sm:$0xf] (%p816_p8)  ;;  %v158_v2 = vld [vmem:[%s137_s4 + $0x10] sm:$0xf] (%p816_p8) }
  0x1f   : > { %v160_v3 = vld [vmem:[%s137_s4 + $0x18] sm:$0xf] (%p816_p8)  ;;  %v162_v4 = vld [vmem:[%s137_s4 + $0x20] sm:$0xf] (%p816_p8)  ;;  %s134_s5 = scalar_lea.vmem (%p816_p8), [#allocation4], %s632_s28 }
  0x20   : > { %155 = vst [vmem:[%s134_s5] sm:$0xf] %v154_v0  ;;  %157 = vst [vmem:[%s134_s5 + $0x4] sm:$0xf] %v156_v1  ;;  %v164_v5 = vld [vmem:[%s137_s4 + $0x28] sm:$0xf] }
  0x21   : > { %159 = vst [vmem:[%s134_s5 + $0x8] sm:$0xf] %v158_v2  ;;  %161 = vst [vmem:[%s134_s5 + $0xc] sm:$0xf] %v160_v3  ;;  %v166_v6 = vld [vmem:[%s137_s4 + $0x30] sm:$0xf] }
  0x22   : > { %163 = vst [vmem:[%s134_s5 + $0x10] sm:$0xf] %v162_v4  ;;  %v168_v7 = vld [vmem:[%s137_s4 + $0x38] sm:$0xf]  ;;  %165 = vst [vmem:[%s134_s5 + $0x14] sm:$0xf] %v164_v5 }
  0x23   : > { %167 = vst [vmem:[%s134_s5 + $0x18] sm:$0xf] %v166_v6  ;;  %169 = vst [vmem:[%s134_s5 + $0x1c] sm:$0xf] %v168_v7  ;;  %v170_v8 = vld [vmem:[%s137_s4 + $0x40] sm:$0xf] }
  0x24   : > { %171 = vst [vmem:[%s134_s5 + $0x20] sm:$0xf] %v170_v8 }
  0x25 PF: > { %213 = sbr.rel (!%p816_p8) target bundleno = 46 (0x2e), region = 61  ;;  %s215_s6 = sand.u32 (%p816_p8), 1, %s746_s18  }
  0x26   : > { %s596_s7 = sshll.u32 (%p816_p8), %s754_s0, 3  ;;  %s633_s8 = smul.u32 (%p816_p8), 80, %s215_s6 }
  0x27   : > { %s220_s11 = scalar_lea.vmem (%p816_p8), %s927_s2, %s596_s7 }
  0x28   : > { %v267_v9 = vld [vmem:[%s220_s11] sm:$0xff] (%p816_p8)  ;;  %v269_v10 = vld [vmem:[%s220_s11 + $0x10] sm:$0xff] (%p816_p8)  ;;  %s217_s12 = scalar_lea.vmem (%p816_p8), [#allocation5], %s633_s8 }
  0x29   : > { %v271_v11 = vld [vmem:[%s220_s11 + $0x20] sm:$0xff] (%p816_p8)  ;;  %v273_v12 = vld [vmem:[%s220_s11 + $0x30] sm:$0xff] (%p816_p8)  ;;  %268 = vst [vmem:[%s217_s12] sm:$0xff] (%p816_p8), %v267_v9  ;;  %270 = vst [vmem:[%s217_s12 + $0x8] sm:$0xff] (%p816_p8), %v269_v10 }
  0x2a   : > { %v275_v13 = vld [vmem:[%s220_s11 + $0x40] sm:$0xff]  ;;  %v277_v14 = vld [vmem:[%s220_s11 + $0x50] sm:$0xff]  ;;  %272 = vst [vmem:[%s217_s12 + $0x10] sm:$0xff] %v271_v11  ;;  %274 = vst [vmem:[%s217_s12 + $0x18] sm:$0xff] %v273_v12 }
  0x2b   : > { %276 = vst [vmem:[%s217_s12 + $0x20] sm:$0xff] %v275_v13  ;;  %278 = vst [vmem:[%s217_s12 + $0x28] sm:$0xff] %v277_v14  ;;  %v279_v15 = vld [vmem:[%s220_s11 + $0x60] sm:$0xff]  ;;  %v281_v16 = vld [vmem:[%s220_s11 + $0x70] sm:$0xff] }
  0x2c   : > { %v283_v17 = vld [vmem:[%s220_s11 + $0x80] sm:$0xff]  ;;  %280 = vst [vmem:[%s217_s12 + $0x30] sm:$0xff] %v279_v15  ;;  %282 = vst [vmem:[%s217_s12 + $0x38] sm:$0xff] %v281_v16  ;;  %v285_v18 = vld [vmem:[%s220_s11 + $0x90] sm:$0xff] }
  0x2d   : > { %284 = vst [vmem:[%s217_s12 + $0x40] sm:$0xff] %v283_v17  ;;  %286 = vst [vmem:[%s217_s12 + $0x48] sm:$0xff] %v285_v18 }
  0x2e PF: > { %p597_p11 = scmp.ge.s32.totalorder %s758_s20, 1  ;;  %p291_p12 = scmp.lt.s32.totalorder %s758_s20, 3 }
  0x30   : > { %p292_p13 = pnand %p597_p11, %p291_p12 }
  0x31   : > { %p332_p0 = scmp.lt.s32.totalorder (!%p292_p13), %s750_s19, 1  ;;  %s845_s13 = sld [smem:[#allocation3 + %s750_s19]] (!%p292_p13) }
  0x32   : > { %295 = sbr.rel (%p292_p13) target bundleno = 157 (0x9d), region = 99  ;;  %s298_s14 = sand.u32 (!%p292_p13), 1, %s742_s17  }
  0x33   : > { %s634_s15 = smul.u32 (!%p292_p13), 36, %s298_s14 }
  0x34   : > { %s635_s17 = smul.u32 (!%p292_p13), 80, %s298_s14 }
  0x35   : > { %s857_s26 = scalar_lea.vmem (!%p292_p13), [#allocation4], %s634_s15 }
  0x37   : > { %s937_s19 = smov (!%p332_p0, %s750_s19), 1  ;;  %v761_v19 = vmov 0.0   ;;  %v600_v20 = vld [vmem:[%s857_s26 + $0x10] sm:$0xf]  ;;  %p605_p1 = scmp.le.s32.totalorder %s845_s13, 0 }
  0x38   : > { %s626_s16 = sshll.u32 %s937_s19, 5  ;;  %v348_v21 = vunpack.c.l.bf16 %v600_v20  ;;  %s860_s19 = scalar_lea.vmem [#allocation5], %s635_s17 }
  0x39   : > { %s852_s24 = scalar_lea.vmem %s928_s3, %s626_s16  ;;  %v863_v27 = vld [vmem:[%s860_s19 + $0x20] sm:$0xff]  ;;  %v602_v33 = vld [vmem:[%s860_s19 + $0x48] sm:$0xff] }
  0x3a   : > { %342 = vst [vmem:[%s852_s24] sm:$0xff] %v761_v19  ;;  %343 = vst [vmem:[%s852_s24 + $0x8] sm:$0xff] %v761_v19  ;;  %v356_v22 = vand.u32 2147483647, %v348_v21  ;;  %v353_v28 = vmax.f32 %v348_v21, 0.0  ;;  %v354_v29 = vmul.f32 %v863_v27, %v348_v21 }
  0x3b   : > { %345 = vst [vmem:[%s852_s24 + $0x18] sm:$0xff] %v761_v19 }
  0x3c   : > { %v357_v23 = vsub.f32 0.0, %v356_v22  ;;  %v355_v30 = vsub.f32 %v353_v28, %v354_v29 }
  0x3e   : > { %v358_v24 = vmul.f32 1.442695, %v357_v23 }
  0x40   : > { %678 = vpow2.f32 %v358_v24 }
  0x4d   : > { %v679_v25 = vpop.eup %678 }
  0x4e   : > { %v360_v26 = vadd.f32 1.0, %v679_v25 }
  0x50   : > { %680 = vlog2.f32 %v360_v26 }
  0x5d   : > { %v681_v31 = vpop.eup %680 }
  0x5e   : > { %v362_v32 = vmul.f32 0.6931472, %v681_v31 }
  0x60   : > { %v363_v34 = vadd.f32 %v362_v32, %v355_v30  ;;  %374 = sbr.rel (%p605_p1) target bundleno = 157 (0x9d), region = 115 }
  0x62   : > { %v366_v35 = vmul.f32 %v602_v33, %v363_v34 }
  0x64   : > { %604 = vst [vmem:[%s852_s24 + $0x10] sm:$0xff] %v366_v35 }
  0x65   : > { %v375_v36 = vld [vmem:[%s857_s26] sm:$0xff]   ;;  %v631_v37 = vld [vmem:[%s857_s26 + $0x8] sm:$0xff]   ;;  %v424_v38 = vmul.f32 %v863_v27, %v363_v34  ;;  %v614_v44 = vld [vmem:[%s857_s26 + $0x14] sm:$0xff]   ;;  %vm417_vm0 = vcmp.gt.f32.partialorder %v863_v27, 0.0 }
  0x66   : > { %v376_v39 = vunpack.c.l.bf16 %v375_v36  ;;  %v383_v40 = vunpack.c.h.bf16 %v375_v36  ;;  %v629_v41 = vunpack.c.l.bf16 %v631_v37  ;;  %v630_v42 = vunpack.c.h.bf16 %v631_v37  ;;  %v612_v43 = vld [vmem:[%s852_s24 + $0x8] sm:$0xff]  ;;  %v618_v52 = vld [vmem:[%s857_s26 + $0x1c] sm:$0xff]  }
  0x67   : > { %v426_v49 = vadd.f32 %v612_v43, %v424_v38  ;;  %v874_v50 = vunpack.c.l.bf16 %v614_v44  ;;  %v876_v51 = vunpack.c.h.bf16 %v614_v44  ;;  %v879_v53 = vunpack.c.l.bf16 %v618_v52  ;;  %v610_v6 = vld [vmem:[%s860_s19 + $0x10] sm:$0xff]  ;;  %v398_v9 = vld [vmem:[%s860_s19] sm:$0xff]  ;;  %v609_v12 = vld [vmem:[%s860_s19 + $0x8] sm:$0xff] }
  0x68   : > { %v377_v45 = vmul.f32 0.5, %v376_v39  ;;  %v384_v46 = vmul.f32 0.5, %v383_v40  ;;  %v391_v47 = vmul.f32 1.442695, %v629_v41  ;;  %v396_v48 = vmul.f32 1.442695, %v630_v42 }
  0x69   : > { %613 = vst [vmem:[%s852_s24 + $0x8] sm:$0xff] %v426_v49  ;;  %v436_v54 = vand.u32 2147483647, %v874_v50  ;;  %v883_v55 = vunpack.c.h.bf16 %v618_v52  ;;  %v453_v56 = vand.u32 2147483647, %v876_v51  ;;  %v611_v13 = vld [vmem:[%s860_s19 + $0x18] sm:$0xff] }
  0x6a   : > { %682 = vtanh.f32 %v377_v45  ;;  %v470_v59 = vand.u32 2147483647, %v879_v53  ;;  %v416_v35 = vld [vmem:[%s852_s24] sm:$0xff]  ;;  %v617_v38 = vld [vmem:[%s860_s19 + $0x30] sm:$0xff]  ;;  %v433_v40 = vmax.f32 %v874_v50, 0.0  ;;  %v450_v43 = vmax.f32 %v876_v51, 0.0 }
  0x6b   : > { %684 = vtanh.f32 %v384_v46  ;;  %v437_v57 = vsub.f32 0.0, %v436_v54  ;;  %v454_v58 = vsub.f32 0.0, %v453_v56  ;;  %v487_v61 = vand.u32 2147483647, %v883_v55  ;;  %v615_v36 = vld [vmem:[%s860_s19 + $0x28] sm:$0xff]  ;;  %v619_v42 = vld [vmem:[%s860_s19 + $0x38] sm:$0xff] }
  0x6c   : > { %686 = vpow2.f32 %v391_v47  ;;  %v471_v63 = vsub.f32 0.0, %v470_v59  ;;  %v434_v41 = vmul.f32 %v615_v36, %v874_v50  ;;  %v451_v44 = vmul.f32 %v617_v38, %v876_v51  ;;  %v621_v45 = vld [vmem:[%s860_s19 + $0x40] sm:$0xff] }
  0x6d   : > { %688 = vpow2.f32 %v396_v48  ;;  %v438_v60 = vmul.f32 1.442695, %v437_v57  ;;  %v455_v62 = vmul.f32 1.442695, %v454_v58  ;;  %v488_v0 = vsub.f32 0.0, %v487_v61 }
  0x6e   : > { %v472_v1 = vmul.f32 1.442695, %v471_v63  ;;  %v467_v46 = vmax.f32 %v879_v53, 0.0  ;;  %v468_v47 = vmul.f32 %v619_v42, %v879_v53  ;;  %v435_v48 = vsub.f32 %v433_v40, %v434_v41 }
  0x6f   : > { %690 = vpow2.f32 %v438_v60  ;;  %v489_v2 = vmul.f32 1.442695, %v488_v0  ;;  %v484_v49 = vmax.f32 %v883_v55, 0.0  ;;  %v485_v52 = vmul.f32 %v621_v45, %v883_v55 }
  0x70   : > { %692 = vpow2.f32 %v455_v62  ;;  %v452_v56 = vsub.f32 %v450_v43, %v451_v44  ;;  %v469_v59 = vsub.f32 %v467_v46, %v468_v47 }
  0x71   : > { %694 = vpow2.f32 %v472_v1  ;;  %v486_v61 = vsub.f32 %v484_v49, %v485_v52 }
  0x72   : > { %696 = vpow2.f32 %v489_v2 }
  0x77   : > { %v683_v3 = vpop.eup %682 }
  0x78   : > { %v685_v4 = vpop.eup %684  ;;  %v379_v5 = vmul.f32 0.5, %v683_v3 }
  0x79   : > { %v687_v7 = vpop.eup %686  ;;  %v386_v8 = vmul.f32 0.5, %v685_v4 }
  0x7a   : > { %v689_v10 = vpop.eup %688  ;;  %v380_v11 = vadd.f32 0.5, %v379_v5  ;;  %v408_v15 = vsub.f32 %v687_v7, %v610_v6  ;;  %v622_v5 = vld [vmem:[%s852_s24 + $0x18] sm:$0xff] }
  0x7b   : > { %v387_v14 = vadd.f32 0.5, %v386_v8  ;;  %v413_v18 = vsub.f32 %v689_v10, %v611_v13 }
  0x7c   : > { %v399_v16 = vsub.f32 %v380_v11, %v398_v9  ;;  %v691_v19 = vpop.eup %690  ;;  %v409_v23 = vmul.f32 %v408_v15, %v408_v15 }
  0x7d   : > { %v403_v17 = vsub.f32 %v387_v14, %v609_v12  ;;  %v693_v21 = vpop.eup %692  ;;  %v440_v24 = vadd.f32 1.0, %v691_v19  ;;  %v414_v29 = vmul.f32 %v413_v18, %v413_v18 }
  0x7e   : > { %v400_v20 = vmul.f32 %v399_v16, %v399_v16  ;;  %v457_v25 = vadd.f32 1.0, %v693_v21  ;;  %v695_v26 = vpop.eup %694 }
  0x7f   : > { %v404_v22 = vmul.f32 %v403_v17, %v403_v17  ;;  %698 = vlog2.f32 %v440_v24  ;;  %v697_v30 = vpop.eup %696  ;;  %v474_v31 = vadd.f32 1.0, %v695_v26 }
  0x80   : > { %700 = vlog2.f32 %v457_v25  ;;  %v491_v33 = vadd.f32 1.0, %v697_v30 }
  0x81   : > { %v405_v28 = vadd.f32 %v404_v22, %v400_v20  ;;  %702 = vlog2.f32 %v474_v31 }
  0x82   : > { %704 = vlog2.f32 %v491_v33 }
  0x83   : > { %v410_v32 = vadd.f32 %v409_v23, %v405_v28 }
  0x85   : > { %v415_v34 = vadd.f32 %v414_v29, %v410_v32 }
  0x87   : > { %v418_v37 = vsel %vm417_vm0, %v415_v34, 0.0 }
  0x88   : > { %v420_v39 = vadd.f32 %v418_v37, %v416_v35 }
  0x8a   : > { %421 = vst [vmem:[%s852_s24] sm:$0xff] %v420_v39 }
  0x8c   : > { %v699_v54 = vpop.eup %698 }
  0x8d   : > { %v701_v57 = vpop.eup %700  ;;  %v442_v50 = vmul.f32 0.6931472, %v699_v54 }
  0x8e   : > { %v459_v58 = vmul.f32 0.6931472, %v701_v57  ;;  %v703_v60 = vpop.eup %702 }
  0x8f   : > { %v443_v51 = vadd.f32 %v442_v50, %v435_v48  ;;  %v705_v62 = vpop.eup %704  ;;  %v476_v0 = vmul.f32 0.6931472, %v703_v60 }
  0x90   : > { %v460_v63 = vadd.f32 %v459_v58, %v452_v56  ;;  %v493_v53 = vmul.f32 0.6931472, %v705_v62 }
  0x91   : > { %v477_v2 = vadd.f32 %v476_v0, %v469_v59 }
  0x92   : > { %v461_v1 = vadd.f32 %v460_v63, %v443_v51  ;;  %v494_v3 = vadd.f32 %v493_v53, %v486_v61 }
  0x94   : > { %v478_v4 = vadd.f32 %v477_v2, %v461_v1 }
  0x96   : > { %v495_v55 = vadd.f32 %v494_v3, %v478_v4 }
  0x98   : > { %v498_v6 = vmul.f32 %v863_v27, %v495_v55 }
  0x9a   : > { %v500_v7 = vadd.f32 %v622_v5, %v498_v6 }
  0x9c   : > { %623 = vst [vmem:[%s852_s24 + $0x18] sm:$0xff] %v500_v7 }
  0x9d PF: > { %s19_s20 = sadd.s32 1, %s758_s20   ;;  %s930_s17 = smov %s746_s18 }
  0x9e   : > { %p16_p2 = scmp.ge.s32.totalorder %s19_s20, 4   ;;  %s931_s18 = smov %s824_s25 }
  0x9f   : > { %s932_s19 = smov %s754_s0  ;;  %s933_s0 = smov %s935_s21 }
  0xa0   :  { %18 = sbr.rel (!%p16_p2) target bundleno = 18 (0x12), region = 178 }

</bundles_post_ra>
